<compile_context>
chip_gen: v5e
topology: v5e:2x2
jax: 0.10.0
libtpu: 0.0.40
codegen_flags: <defaults>
</compile_context>

<pallas_src>
import functools

import jax
import jax.numpy as jnp
from jax.experimental import pallas as pl
from jax.experimental.pallas import tpu as pltpu


def _adaln_modulate_kernel(x_ref, shift_ref, scale_ref, o_ref):
    """LayerNorm (no affine, eps=1e-6) then x_norm * (1 + scale) + shift."""
    eps = 1e-6
    x = x_ref[...].astype(jnp.float32)                     # (BT, TS, D)
    d_inv = 1.0 / x.shape[-1]

    # Two-pass statistics: the centered tensor is reused for the output, so
    # this costs the same VPU work as E[x^2]-mean^2 but cannot go negative.
    mean = jnp.sum(x, axis=-1, keepdims=True) * d_inv
    xc = x - mean
    var = jnp.sum(xc * xc, axis=-1, keepdims=True) * d_inv
    inv = jax.lax.rsqrt(var + eps)

    # Per-batch-row modulation params, broadcast over the TS axis.
    scale1p = 1.0 + scale_ref[...].astype(jnp.float32)     # (BT, 1, D)
    shift = shift_ref[...].astype(jnp.float32)             # (BT, 1, D)

    # NOTE: folding into x*a + b (a = inv*scale1p, b = shift - mean*a) is not
    # applied: scale/shift vary along D while inv/mean vary along TS, so a and
    # b are full (TS, D) tensors and the fold costs one *extra* VPU op/elem.
    o_ref[...] = ((xc * inv) * scale1p + shift).astype(o_ref.dtype)


def _vmem_capacity_bytes():
    try:
        cap = getattr(pltpu.get_tpu_info(), "vmem_capacity_bytes", None)
        if cap:
            return int(cap)
    except Exception:
        pass
    return 64 << 20          # conservative (v7x-sized) fallback


def _choose_blocks(B, S, D, x_itemsize, vmem_cap):
    """Pick (batch_tile, seq_tile, grid) for (BT, TS, D) x-blocks."""
    small_vmem = vmem_cap <= (64 << 20)                    # v7x
    # Bytes of x (in its own dtype) resident per block.  f32 upcast temps and
    # in/out double-buffering multiply this, so 4 MiB stays inside 64 MiB.
    tile_budget = (4 << 20) if small_vmem else (8 << 20)
    rows_budget = max(8, tile_budget // (x_itemsize * D))
    rows_budget = min(rows_budget, 2048)

    if S > rows_budget:
        # Long sequences: one batch row per block, ragged-tile the sequence.
        bt = 1
        ts = max(8, (rows_budget // 8) * 8)
    else:
        # Short sequences: fold batch rows into the block (roofline sweet
        # spot, fewer ~0.35us grid steps).
        ts = S
        bt = max(1, min(B, rows_budget // max(S, 1)))
        # Megacore balance (v7x): keep at least 2 grid points when possible.
        if bt >= B:
            if B >= 2:
                bt = (B + 1) // 2
            elif S >= 16:
                bt = 1
                ts = min(S, ((S + 1) // 2 + 7) // 8 * 8)
    grid = (pl.cdiv(B, bt), pl.cdiv(S, ts))
    return bt, ts, grid


@functools.partial(jax.jit, static_argnames=("seq_block",))
def ada_layer_norm_zero(x, emb, weight, bias, *, seq_block=None):
    """
    x:      [B, S, D]
    emb:    [B, D]
    weight: [6D, D]   (PyTorch nn.Linear layout)
    bias:   [6D]
    Returns (x_out, gate_msa, shift_mlp, scale_mlp, gate_mlp).
    """
    B, S, D = x.shape

    # --- SiLU + Linear on the embedding (tiny GEMM, plain JAX / MXU) -------
    e = jax.nn.silu(emb)
    if e.dtype != weight.dtype:
        e = e.astype(weight.dtype)          # cast tiny [B,D]; never the weight
    mod = jax.lax.dot_general(
        e, weight,
        dimension_numbers=(((1,), (1,)), ((), ())),        # e @ weight.T
        preferred_element_type=jnp.float32,
    ) + bias.astype(jnp.float32)[None, :]                   # [B, 6D] in f32

    param_dtype = jnp.result_type(emb.dtype, weight.dtype, bias.dtype)
    out_dtype = jnp.result_type(x.dtype, param_dtype)

    shift_msa = mod[:, 0 * D:1 * D].reshape(B, 1, D)        # f32 -> kernel
    scale_msa = mod[:, 1 * D:2 * D].reshape(B, 1, D)        # f32 -> kernel
    gate_msa = mod[:, 2 * D:3 * D].astype(param_dtype)
    shift_mlp = mod[:, 3 * D:4 * D].astype(param_dtype)
    scale_mlp = mod[:, 4 * D:5 * D].astype(param_dtype)
    gate_mlp = mod[:, 5 * D:6 * D].astype(param_dtype)

    # --- Tiled LayerNorm + modulation kernel --------------------------------
    vmem_cap = _vmem_capacity_bytes()
    if seq_block is not None:               # test hook: force a seq tile
        bt, ts = 1, min(int(seq_block), S)
        grid = (B, pl.cdiv(S, ts))
    else:
        bt, ts, grid = _choose_blocks(B, S, D, x.dtype.itemsize, vmem_cap)

    # VMEM need: double-buffered in/out x blocks + shift/scale blocks + f32
    # intermediates + slack; capped below physical capacity (v7x: 64 MiB).
    blk = bt * ts * D
    need = (2 * blk * (x.dtype.itemsize + jnp.dtype(out_dtype).itemsize)
            + 4 * bt * D * 4
            + 3 * blk * 4
            + (2 << 20))
    cap = (48 << 20) if vmem_cap <= (64 << 20) else (100 << 20)
    vmem_limit = int(min(max(need, 32 << 20), cap))

    x_out = pl.pallas_call(
        _adaln_modulate_kernel,
        out_shape=jax.ShapeDtypeStruct((B, S, D), out_dtype),
        grid=grid,
        in_specs=[
            pl.BlockSpec((bt, ts, D), lambda b, s: (b, s, 0)),
            pl.BlockSpec((bt, 1, D), lambda b, s: (b, 0, 0)),
            pl.BlockSpec((bt, 1, D), lambda b, s: (b, 0, 0)),
        ],
        out_specs=pl.BlockSpec((bt, ts, D), lambda b, s: (b, s, 0)),
        compiler_params=pltpu.CompilerParams(
            dimension_semantics=("parallel", "parallel"),
            vmem_limit_bytes=vmem_limit,
        ),
    )(x, shift_msa, scale_msa)

    return x_out, gate_msa, shift_mlp, scale_mlp, gate_mlp


def ada_layer_norm_zero_ref(x, emb, weight, bias):
    """Plain-JAX reference for correctness checking."""
    e = jax.nn.silu(emb)
    mod = (jnp.dot(e.astype(jnp.float32), weight.astype(jnp.float32).T)
           + bias.astype(jnp.float32))
    param_dtype = jnp.result_type(emb.dtype, weight.dtype, bias.dtype)
    out_dtype = jnp.result_type(x.dtype, param_dtype)
    D = x.shape[-1]
    shift_msa, scale_msa, gate_msa, shift_mlp, scale_mlp, gate_mlp = [
        mod[:, i * D:(i + 1) * D] for i in range(6)
    ]
    xf = x.astype(jnp.float32)
    mean = jnp.mean(xf, axis=-1, keepdims=True)
    var = jnp.mean((xf - mean) ** 2, axis=-1, keepdims=True)
    xn = (xf - mean) * jax.lax.rsqrt(var + 1e-6)
    x_out = (xn * (1.0 + scale_msa[:, None, :])
             + shift_msa[:, None, :]).astype(out_dtype)
    cast = lambda t: t.astype(param_dtype)
    return x_out, cast(gate_msa), cast(shift_mlp), cast(scale_mlp), cast(gate_mlp)


if __name__ == "__main__":
    key = jax.random.PRNGKey(0)
    kx, ke, kw, kb, kx2, ke2 = jax.random.split(key, 6)

    # --- Small canonical test shapes ----------------------------------------
    B, S, D = 2, 8, 32  # batch, seq, embedding_dim
    x = jax.random.normal(kx, (B, S, D), dtype=jnp.float32)
    emb = jax.random.normal(ke, (B, D), dtype=jnp.float32)
    # nn.Linear(embedding_dim, 6*embedding_dim, bias=True) params:
    weight = jax.random.normal(kw, (6 * D, D), dtype=jnp.float32) * 0.02
    bias = jax.random.normal(kb, (6 * D,), dtype=jnp.float32) * 0.02

    outs = jax.block_until_ready(ada_layer_norm_zero(x, emb, weight, bias))
    refs = ada_layer_norm_zero_ref(x, emb, weight, bias)
    for o, r in zip(outs, refs):
        assert o.shape == r.shape and o.dtype == r.dtype
        assert jnp.allclose(o, r, atol=1e-4, rtol=1e-4), "mismatch vs reference"

    # --- Ragged-grid test: seq length not divisible by the forced tile ------
    S2 = 13
    x2 = jax.random.normal(kx2, (B, S2, D), dtype=jnp.float32)
    emb2 = jax.random.normal(ke2, (B, D), dtype=jnp.float32)
    outs2 = jax.block_until_ready(
        ada_layer_norm_zero(x2, emb2, weight, bias, seq_block=8))
    refs2 = ada_layer_norm_zero_ref(x2, emb2, weight, bias)
    for o, r in zip(outs2, refs2):
        assert o.shape == r.shape and o.dtype == r.dtype
        assert jnp.allclose(o, r, atol=1e-4, rtol=1e-4), "ragged mismatch"

    print("KERNEL_OK")
</pallas_src>

<mosaic_0001>
module attributes {stable_mosaic.version = 11 : i64} {
  func.func @_adaln_modulate_kernel(%arg0: i32, %arg1: i32, %arg2: memref<1x8x32xf32, #tpu.memory_space<vmem>>, %arg3: memref<1x1x32xf32, #tpu.memory_space<vmem>>, %arg4: memref<1x1x32xf32, #tpu.memory_space<vmem>>, %arg5: memref<1x8x32xf32, #tpu.memory_space<vmem>>) attributes {dimension_semantics = [#tpu.dimension_semantics<parallel>, #tpu.dimension_semantics<parallel>], iteration_bounds = array<i64: 2, 1>, scalar_prefetch = 0 : i64, scratch_operands = 0 : i64, tpu.core_type = #tpu.core_type<tc>, window_params = [{transform_indices = @transform_0, window_bounds = array<i64: 1, 8, 32>}, {transform_indices = @transform_1, window_bounds = array<i64: 1, 1, 32>}, {transform_indices = @transform_2, window_bounds = array<i64: 1, 1, 32>}, {transform_indices = @transform_3, window_bounds = array<i64: 1, 8, 32>}]} {
    %c0 = arith.constant 0 : index
    %c0_0 = arith.constant 0 : index
    %c0_1 = arith.constant 0 : index
    %0 = vector.load %arg2[%c0, %c0_0, %c0_1] : memref<1x8x32xf32, #tpu.memory_space<vmem>>, vector<1x8x32xf32>
    %cst = arith.constant dense<0.000000e+00> : vector<1x8xf32>
    %1 = vector.multi_reduction <add>, %0, %cst [2] : vector<1x8x32xf32> to vector<1x8xf32>
    %2 = vector.shape_cast %1 : vector<1x8xf32> to vector<1x8x1xf32>
    %cst_2 = arith.constant 3.125000e-02 : f32
    %3 = vector.broadcast %cst_2 : f32 to vector<1x8x1xf32>
    %4 = arith.mulf %2, %3 : vector<1x8x1xf32>
    %5 = vector.broadcast %4 : vector<1x8x1xf32> to vector<1x8x32xf32>
    %6 = arith.subf %0, %5 : vector<1x8x32xf32>
    %7 = arith.mulf %6, %6 : vector<1x8x32xf32>
    %cst_3 = arith.constant dense<0.000000e+00> : vector<1x8xf32>
    %8 = vector.multi_reduction <add>, %7, %cst_3 [2] : vector<1x8x32xf32> to vector<1x8xf32>
    %9 = vector.shape_cast %8 : vector<1x8xf32> to vector<1x8x1xf32>
    %cst_4 = arith.constant 3.125000e-02 : f32
    %10 = vector.broadcast %cst_4 : f32 to vector<1x8x1xf32>
    %11 = arith.mulf %9, %10 : vector<1x8x1xf32>
    %cst_5 = arith.constant 9.99999997E-7 : f32
    %12 = vector.broadcast %cst_5 : f32 to vector<1x8x1xf32>
    %13 = arith.addf %11, %12 : vector<1x8x1xf32>
    %14 = math.rsqrt %13 : vector<1x8x1xf32>
    %c0_6 = arith.constant 0 : index
    %c0_7 = arith.constant 0 : index
    %c0_8 = arith.constant 0 : index
    %15 = vector.load %arg4[%c0_6, %c0_7, %c0_8] : memref<1x1x32xf32, #tpu.memory_space<vmem>>, vector<1x1x32xf32>
    %cst_9 = arith.constant 1.000000e+00 : f32
    %16 = vector.broadcast %cst_9 : f32 to vector<1x1x32xf32>
    %17 = arith.addf %16, %15 : vector<1x1x32xf32>
    %c0_10 = arith.constant 0 : index
    %c0_11 = arith.constant 0 : index
    %c0_12 = arith.constant 0 : index
    %18 = vector.load %arg3[%c0_10, %c0_11, %c0_12] : memref<1x1x32xf32, #tpu.memory_space<vmem>>, vector<1x1x32xf32>
    %19 = vector.broadcast %14 : vector<1x8x1xf32> to vector<1x8x32xf32>
    %20 = arith.mulf %6, %19 : vector<1x8x32xf32>
    %21 = vector.broadcast %17 : vector<1x1x32xf32> to vector<1x8x32xf32>
    %22 = arith.mulf %20, %21 : vector<1x8x32xf32>
    %23 = vector.broadcast %18 : vector<1x1x32xf32> to vector<1x8x32xf32>
    %24 = arith.addf %22, %23 : vector<1x8x32xf32>
    %c0_13 = arith.constant 0 : index
    %c0_14 = arith.constant 0 : index
    %c0_15 = arith.constant 0 : index
    %25 = vector.load %arg5[%c0_13, %c0_14, %c0_15] : memref<1x8x32xf32, #tpu.memory_space<vmem>>, vector<1x8x32xf32>
    tpu.vector_store %arg5[%c0_13, %c0_14, %c0_15], %24 {strides = array<i32>} : memref<1x8x32xf32, #tpu.memory_space<vmem>>, vector<1x8x32xf32>,
    return
  }
  func.func @transform_0(%arg0: i32, %arg1: i32) -> (i32, i32, i32) {
    %c0_i32 = arith.constant 0 : i32
    %c0_i32_0 = arith.constant 0 : i32
    return %arg0, %arg1, %c0_i32 : i32, i32, i32
  }
  func.func @transform_1(%arg0: i32, %arg1: i32) -> (i32, i32, i32) {
    %c0_i32 = arith.constant 0 : i32
    %c0_i32_0 = arith.constant 0 : i32
    %c0_i32_1 = arith.constant 0 : i32
    return %arg0, %c0_i32, %c0_i32_0 : i32, i32, i32
  }
  func.func @transform_2(%arg0: i32, %arg1: i32) -> (i32, i32, i32) {
    %c0_i32 = arith.constant 0 : i32
    %c0_i32_0 = arith.constant 0 : i32
    %c0_i32_1 = arith.constant 0 : i32
    return %arg0, %c0_i32, %c0_i32_0 : i32, i32, i32
  }
  func.func @transform_3(%arg0: i32, %arg1: i32) -> (i32, i32, i32) {
    %c0_i32 = arith.constant 0 : i32
    %c0_i32_0 = arith.constant 0 : i32
    return %arg0, %arg1, %c0_i32 : i32, i32, i32
  }
}

</mosaic_0001>

<bundles_post_ra>
// kernel: ada_layer_norm_zero.1
= control target key start
LH: loop header
LB: loop body
LE: loop exit
PB: predicated region body
PF: predicated region fallthrough
CT: control target
= control target key end

     0   :  { %8 = vsyncpa [#allocation3], 0  ;;  %s646_s0 = inlined_call_operand.vmem [shape: f32[2,8,32], index: 0, kind: input, shape index: {}]   ;;  %s647_s1 = inlined_call_operand.vmem [shape: f32[2,1,32], index: 1, kind: input, shape index: {}]   ;;  %s648_s2 = inlined_call_operand.vmem [shape: f32[2,1,32], index: 2, kind: input, shape index: {}]   ;;  %s649_s3 = inlined_call_operand.hbm [shape: f32[2,8,32], index: 3, kind: output, shape index: {}]  }
   0x1   :  { %10 = vsyncpa [#allocation3 + $0x1], 0  ;;  %s530_s12 = smov 0   ;;  %s532_s13 = smov 0  }
   0x2   :  { %s534_s14 = smov 0   ;;  %s536_s15 = smov 0  }
   0x3   :  { %s538_s16 = smov 0   ;;  %s540_s17 = smov 0  }
   0x4 LB: > { %s361_s18 = sadd.s32 4294967295, %s508_s17   ;;  %s362_s19 = sadd.s32 4294967294, %s508_s17   ;;  %s508_s17 = sphi %s540_s17, %s16_s17   ;;  %s504_s16 = sphi %s538_s16, %s656_s16   ;;  %s500_s15 = sphi %s536_s15, %s655_s15   ;;  %s496_s14 = sphi %s534_s14, %s654_s14   ;;  %s492_s13 = sphi %s532_s13, %s653_s13   ;;  %s488_s12 = sphi %s530_s12, %s652_s12  }
   0x5   : > { %s28_s20 = sadd.s32 1, %s504_s16  ;;  %s117_s21 = sadd.s32 1, %s496_s14 }
   0x6   : > { %p30_p0 = scmp.ge.s32.totalorder %s28_s20, 2  ;;  %p127_p1 = scmp.ne.s32.totalorder %s496_s14, %s492_s13 }
   0x7   : > { %p128_p2 = scmp.eq.s32.totalorder %s361_s18, 1  ;;  %p133_p3 = scmp.ne.s32.totalorder %s492_s13, %s488_s12 }
   0x8   : > { %s658_s20 = smov (%p30_p0, %s28_s20), 0  ;;  %p134_p5 = scmp.eq.s32.totalorder %s362_s19, 1 }
   0x9   : > { %p570_p4 = por %p128_p2, %p127_p1  ;;  %s112_s23 = ssub.s32 %s504_s16, %s658_s20 }
   0xa   : > { %p365_p6 = scmp.ge.s32.totalorder %s508_s17, 1  ;;  %p115_p7 = scmp.eq.s32.totalorder %s112_s23, 0 }
   0xb   : > { %p577_p8 = por %p134_p5, %p133_p3  ;;  %p174_p9 = scmp.lt.s32.totalorder %s508_s17, 3 }
   0xc   : > { %s583_s25 = scalar_select %p115_p7, %s496_s14, %s117_s21  }
   0xd   : > { %p175_p10 = pnand %p365_p6, %p174_p9 }
   0xe   : > { %p206_p11 = scmp.lt.s32.totalorder (!%p175_p10), %s500_s15, 1  ;;  %s203_s10 = sand.u32 (!%p175_p10), 1, %s492_s13  }
   0xf   : > { %178 = sbr.rel (%p175_p10) target bundleno = 296 (0x128), region = 32  ;;  %s366_s11 = sshll.u32 (!%p175_p10), %s203_s10, 3 }
  0x10   : > { %s369_s18 = sshll.u32 (!%p175_p10), %s500_s15, 3  ;;  %s205_s29 = scalar_lea.vmem (!%p175_p10), [#allocation2], %s366_s11 }
  0x11   : > { %s267_s23 = scalar_lea.hbm (!%p175_p10), %s649_s3, %s369_s18  ;;  %s269_s4 = sshll.u32 (!%p175_p10), %s205_s29, 4  ;;  %s270_s4 = int_to_ptr.vmem [resolvable:$true] %s269_s4 }
  0x12   : > { %s271_s5 = sshll.u32 (!%p175_p10), %s267_s23, 4  ;;  %s272_s5 = int_to_ptr.hbm [resolvable:$true] %s271_s5 }
  0x14   : > { %s587_s26 = scalar_select %p206_p11, %s500_s15, 1  ;;  %vm220_vm0 = vcmask 261120  }
  0x15   : > { %s256_s15 = scalar_lea.sflag [#allocation3], %s203_s10 }
  0x16   : > { %s367_s27 = sshll.u32 %s587_s26, 3  ;;  %s215_s30 = scalar_lea.vmem %s647_s1, %s587_s26 }
  0x17   : > { %s212_s6 = scalar_lea.vmem %s646_s0, %s367_s27  ;;  %s218_s9 = scalar_lea.vmem %s648_s2, %s587_s26  ;;  %v427_v21 = vld [vmem:[%s215_s30] ss:$0 sm:$0xff] }
  0x18   : > { %v219_v0 = vld [vmem:[%s212_s6] sm:$0xff]  ;;  %s444_s6 = sshra.s32 %s272_s5, 4  ;;  %s450_s30 = scalar_lea.hbm %s649_s3, 16  ;;  %s445_s6 = int_to_ptr.hbm [resolvable:$true] %s444_s6 }
  0x19   : > { %v221_v1 = vsel %vm220_vm0, %v219_v0, 0.0  ;;  %v242_v12 = vld [vmem:[%s218_s9] sm:$0x1]  ;;  %s446_s7 = scalar_lea.hbm %s445_s6, 8  ;;  %p451_p1 = scmp.lt.s32.totalorder %s445_s6, %s649_s3 }
  0x1a   : > { %222 = vadd.xlane.f32.xlu0 %v221_v1  ;;  %v243_v15 = vadd.f32 1.0, %v242_v12  ;;  %p447_p12 = scmp.ne.s32.totalorder %s445_s6, %s446_s7  ;;  %p452_p2 = scmp.lt.s32.totalorder %s450_s30, %s446_s7 }
  0x1c   : > { %v247_v18 = vperm.slane %v243_v15, 0  ;;  %p448_p13 = pnand %p447_p12, %p570_p4  ;;  %p453_p3 = por %p452_p2, %p451_p1 }
  0x1e   : > { %p449_p0 = pneg %p448_p13 }
  0x20   : > { %p454_p5 = pnand %p453_p3, %p449_p0 }
  0x8d   : > { %v223_v2 = vpop.xlane.xlu0 %222 }
  0x8e   : > { %v224_v3 = vmul.f32 0.03125, %v223_v2 }
  0x90   : > { %v225_v4 = vsub.f32 %v219_v0, %v224_v3 }
  0x92   : > { %v226_v5 = vmul.f32 %v225_v4, %v225_v4 }
  0x94   : > { %v227_v6 = vsel %vm220_vm0, %v226_v5, 0.0 }
  0x95   : > { %228 = vadd.xlane.f32.xlu0 %v227_v6 }
 0x108   : > { %v229_v7 = vpop.xlane.xlu0 %228 }
 0x109   : > { %v230_v8 = vmul.f32 0.03125, %v229_v7 }
 0x10b   : > { %v231_v9 = vadd.f32 1e-06, %v230_v8 }
 0x10d   : > { %428 = vrsqrt.f32 %v231_v9  ;;  %vm238_vm2 = vweird.f32 %v231_v9 }
 0x113   : > { %v429_v10 = vpop.eup %428 }
 0x114   : > { %v233_v11 = vmul.f32 %v429_v10, %v231_v9  ;;  %vm239_vm1 = vweird.f32 %v429_v10 }
 0x115   : > { %vm240_vm3 = vmor %vm238_vm2, %vm239_vm1 }
 0x116   : > { %v234_v13 = vmul.f32 %v429_v10, %v233_v11 }
 0x118   : > { %v235_v14 = vmul.f32 0.5, %v234_v13 }
 0x11a   : > { %v236_v16 = vsub.f32 1.5, %v235_v14 }
 0x11c   : > { %v237_v17 = vmul.f32 %v429_v10, %v236_v16 }
 0x11e   : > { %v241_v19 = vsel %vm240_vm3, %v429_v10, %v237_v17 }
 0x11f   : > { %v245_v20 = vmul.f32 %v241_v19, %v225_v4 }
 0x121   : > { %v249_v22 = vmul.f32 %v247_v18, %v245_v20 }
 0x123   : > { %v253_v23 = vadd.f32 %v427_v21, %v249_v22 }
 0x125   : > { %254 = vst.msk [vmem:[%s205_s29] sm:$0xff] %vm220_vm0, %v253_v23 }
 0x126   : > { %457 = shalt.err (!%p454_p5)
}
 0x127   : > { %372 = dma.vmem_to_hbm [thread:$0]  (%p570_p4), %s270_s4, 128, %s272_s5, %s256_s15  }
 0x128 PF: > { %p378_p6 = scmp.ge.s32.totalorder %s508_s17, 2  ;;  %s283_s10 = sand.u32 1, %s488_s12  }
 0x129   : > { %s284_s18 = scalar_lea.sflag [#allocation3], %s283_s10 }
 0x12a   : > { %p375_p7 = pnand %p378_p6, %p577_p8 }
 0x12c   : > { %p376_p9 = pneg %p375_p7 }
 0x12e   : > { %483 = dma.done.wait (%p376_p9), %s284_s18, 128  }
 0x12f   : > { %485 = vsyncadd (%p376_p9), %s284_s18, 4294967168  ;;  %s16_s17 = sadd.s32 1, %s508_s17   ;;  %s652_s12 = smov %s492_s13 }
 0x130   : > { %p13_p10 = scmp.ge.s32.totalorder %s16_s17, 4   ;;  %s653_s13 = smov %s496_s14 }
 0x131   : > { %s654_s14 = smov %s583_s25  ;;  %s655_s15 = smov %s504_s16 }
 0x132   : > { %s656_s16 = smov %s658_s20  ;;  %15 = sbr.rel (!%p13_p10) target bundleno = 4 (0x4), region = 73 }
 0x137   :  { %290 = vsyncpa [#allocation3], 1 }
 0x138   :  { %292 = vsyncpa [#allocation3 + $0x1], 1 }

</bundles_post_ra>
